<compile_context>
chip_gen: v6e
topology: v6e:2x2x1
jax: 0.10.0
libtpu: 0.0.40
codegen_flags: <defaults>
</compile_context>

<pallas_src>
import math
import functools

import jax
import jax.numpy as jnp
from jax.experimental import pallas as pl
from jax.experimental.pallas import tpu as pltpu


def _round_up(v, m):
    return ((v + m - 1) // m) * m


def _pick_tile(npad, pref):
    """Largest multiple of 128 <= pref that divides npad (npad % 128 == 0)."""
    t = min(pref, npad)
    t = max((t // 128) * 128, 128)
    while t > 128 and npad % t != 0:
        t -= 128
    return t


def _make_hyp_agg_kernel(tn, emit_att):
    def kernel(left_ref, right_ref, adj_ref, x_ref, *out_refs):
        if emit_att:
            att_ref, sup_ref = out_refs
        else:
            (sup_ref,) = out_refs

        j = pl.program_id(1)

        # Output block index is constant over the (last, "arbitrary") j axis,
        # so sup_ref stays VMEM-resident and serves as the f32 accumulator.
        @pl.when(j == 0)
        def _init():
            sup_ref[...] = jnp.zeros_like(sup_ref)

        # (TM, 1) + (1, TN) -> (TM, TN); bias already folded into `left`.
        logits = left_ref[...] + right_ref[...]
        sig = jax.nn.sigmoid(logits)                             # EUP, f32
        # bf16 mask multiply (exact for 0/1 adjacency); result is stored /
        # fed to the MXU in bf16 anyway.
        att = sig.astype(jnp.bfloat16) * adj_ref[...].astype(jnp.bfloat16)
        if emit_att:
            att_ref[...] = att                                   # lane-dense bf16 store

        # Resident x_tangent (whole matrix in VMEM, DMA'd once): slice the
        # j-th column block.  bf16 x bf16 -> f32 accumulate on the MXU.
        start = pl.multiple_of(j * tn, tn)
        xj = x_ref[pl.ds(start, tn), :]
        sup_ref[...] += jnp.dot(att, xj, preferred_element_type=jnp.float32)

    return kernel


def hyp_agg_forward(x_tangent, adj, weight, bias, *, tm=1024, tn=512,
                    return_att=False):
    """HypAgg forward hot path (use_att=True, local_agg=False).

    x_tangent: (n, d) tangent-space features (= manifold.logmap0(x, c)).
    adj:       (n, n) dense adjacency (0/1 mask; bf16-exact).
    weight:    (1, 2d) nn.Linear weight; bias: (1,).

    Returns `output` (n, d) f32, or (adj_att, output) if return_att=True.
    # TODO(synk): manifold.expmap0/proj come from an injected manifold object
    # that is not defined in the spec; for the Euclidean manifold they are
    # identities, so `output` here equals support_t = adj_att @ x_tangent.
    """
    n, d = x_tangent.shape
    x = x_tangent.astype(jnp.float32)
    w = weight.astype(jnp.float32).reshape(2 * d)
    b = bias.astype(jnp.float32).reshape(())

    # Exact decomposition of Linear([x_i ; x_j]); hoisted so each logit matvec
    # is computed once instead of once per attention tile.  Bias folded into
    # the row ("left") logits.
    left = x @ w[:d] + b          # (n,)
    right = x @ w[d:]             # (n,)

    # Lane/sublane-friendly sizes.  npad stays at round_up(n, 128) so the
    # adjacency does NOT get a full-size pad/cast pass when n is aligned.
    npad = _round_up(max(n, 1), 128)
    dpad = _round_up(max(d, 1), 128)
    tm = _pick_tile(npad, tm)
    tn = _pick_tile(npad, tn)
    # v7x megacore: keep >= 2 row blocks on the "parallel" axis when possible.
    if npad // tm < 2:
        tm_half = _pick_tile(npad, max(npad // 2, 128))
        if npad // tm_half >= 2:
            tm = tm_half

    need_pad_n = npad != n
    need_pad_d = dpad != d

    if need_pad_n:
        # Padded adj entries are zero, so the padded region contributes
        # nothing (sigmoid of padded logits is 0.5 but is masked to 0).
        adj_p = jnp.zeros((npad, npad), jnp.bfloat16).at[:n, :n].set(
            adj.astype(jnp.bfloat16))
        left_p = jnp.zeros((npad, 1), jnp.float32).at[:n, 0].set(left)
        right_p = jnp.zeros((1, npad), jnp.float32).at[0, :n].set(right)
    else:
        # No extra full-n^2 HBM pass: feed adj as-is (kernel casts in-register).
        adj_p = adj
        left_p = left.reshape(npad, 1)
        right_p = right.reshape(1, npad)

    if need_pad_n or need_pad_d:
        x_p = jnp.zeros((npad, dpad), jnp.bfloat16).at[:n, :d].set(
            x.astype(jnp.bfloat16))
    else:
        x_p = x.astype(jnp.bfloat16)

    grid = (npad // tm, npad // tn)

    out_shape = []
    out_specs = []
    if return_att:
        out_shape.append(jax.ShapeDtypeStruct((npad, npad), jnp.bfloat16))
        out_specs.append(pl.BlockSpec((tm, tn), lambda i, j: (i, j)))
    out_shape.append(jax.ShapeDtypeStruct((npad, dpad), jnp.float32))
    out_specs.append(pl.BlockSpec((tm, dpad), lambda i, j: (i, 0)))

    kernel = _make_hyp_agg_kernel(tn, return_att)

    results = pl.pallas_call(
        kernel,
        out_shape=tuple(out_shape),
        grid_spec=pltpu.PrefetchScalarGridSpec(
            num_scalar_prefetch=0,
            grid=grid,
            in_specs=[
                pl.BlockSpec((tm, 1), lambda i, j: (i, 0)),       # left logits (+bias)
                pl.BlockSpec((1, tn), lambda i, j: (0, j)),       # right logits
                pl.BlockSpec((tm, tn), lambda i, j: (i, j)),      # adj tile
                pl.BlockSpec((npad, dpad), lambda i, j: (0, 0)),  # x resident (bf16)
            ],
            out_specs=out_specs,
        ),
        compiler_params=pltpu.CompilerParams(
            dimension_semantics=("parallel", "arbitrary"),
            vmem_limit_bytes=64 * 1024 * 1024),
    )(left_p, right_p, adj_p, x_p)

    if return_att:
        att_p, sup_p = results
    else:
        (sup_p,) = results

    # Avoid post-slice copies when shapes are already aligned.
    output = sup_p if (not need_pad_n and not need_pad_d) else sup_p[:n, :d]
    if return_att:
        adj_att = att_p if not need_pad_n else att_p[:n, :n]
        return adj_att, output
    return output


# ----------------------------- pure-JAX reference ---------------------------

def dense_att_ref(x, adj, weight, bias):
    """Literal replica of the PyTorch DenseAtt forward (concat + Linear)."""
    n, d = x.shape
    x_left = jnp.broadcast_to(x[:, None, :], (n, n, d))
    x_right = jnp.broadcast_to(x[None, :, :], (n, n, d))
    x_cat = jnp.concatenate([x_left, x_right], axis=2)        # (n, n, 2d)
    att = (x_cat @ weight.T + bias)[..., 0]
    return adj * jax.nn.sigmoid(att)


def hyp_agg_ref(x_tangent, adj, weight, bias):
    att = dense_att_ref(x_tangent, adj, weight, bias)
    return att, att @ x_tangent


if __name__ == "__main__":
    n = 8              # number of nodes
    in_features = 32   # feature dim d

    key = jax.random.PRNGKey(0)
    kx, kadj, kw, kb = jax.random.split(key, 4)

    x = jax.random.normal(kx, (n, in_features), dtype=jnp.float32)
    adj = jax.random.bernoulli(kadj, p=0.4, shape=(n, n)).astype(jnp.float32)

    # Deterministic Linear(2*in_features, 1) init (PyTorch-style uniform bound).
    bound = 1.0 / math.sqrt(2.0 * in_features)
    weight = jax.random.uniform(kw, (1, 2 * in_features), minval=-bound,
                                maxval=bound, dtype=jnp.float32)
    bias = jax.random.uniform(kb, (1,), minval=-bound, maxval=bound,
                              dtype=jnp.float32)

    # Hot path: only the aggregated features (what HypAgg.forward returns).
    output = hyp_agg_forward(x, adj, weight, bias)
    output = jax.block_until_ready(output)

    # Variant that also materializes the attention map (for testing / local_agg).
    adj_att, output2 = hyp_agg_forward(x, adj, weight, bias, return_att=True)
    adj_att = jax.block_until_ready(adj_att)
    output2 = jax.block_until_ready(output2)

    att_ref, out_ref = hyp_agg_ref(x, adj, weight, bias)
    assert output.shape == (n, in_features)
    assert output2.shape == (n, in_features)
    assert adj_att.shape == (n, n)
    # adj_att / the dot are computed in bf16 (bandwidth / MXU), so compare with
    # bf16-level tolerance.
    assert jnp.allclose(adj_att.astype(jnp.float32), att_ref,
                        atol=1e-2, rtol=1e-2), "attention mismatch vs reference"
    assert jnp.allclose(output, out_ref,
                        atol=3e-2, rtol=3e-2), "aggregation mismatch vs reference"
    assert jnp.allclose(output2, out_ref,
                        atol=3e-2, rtol=3e-2), "aggregation (att variant) mismatch"

    print("KERNEL_OK")
</pallas_src>

<mosaic_0001>
module attributes {stable_mosaic.version = 11 : i64} {
  func.func @kernel(%arg0: i32, %arg1: i32, %arg2: memref<128x1xf32, #tpu.memory_space<vmem>>, %arg3: memref<1x128xf32, #tpu.memory_space<vmem>>, %arg4: memref<128x128xbf16, #tpu.memory_space<vmem>>, %arg5: memref<128x128xbf16, #tpu.memory_space<vmem>>, %arg6: memref<128x128xf32, #tpu.memory_space<vmem>>) attributes {dimension_semantics = [#tpu.dimension_semantics<parallel>, #tpu.dimension_semantics<arbitrary>], iteration_bounds = array<i64: 1, 1>, scalar_prefetch = 0 : i64, scratch_operands = 0 : i64, tpu.core_type = #tpu.core_type<tc>, window_params = [{transform_indices = @transform_0, window_bounds = array<i64: 128, 1>}, {transform_indices = @transform_1, window_bounds = array<i64: 1, 128>}, {transform_indices = @transform_2, window_bounds = array<i64: 128, 128>}, {pipeline_mode = #tpu.pipeline_mode<synchronous>, transform_indices = @transform_3, window_bounds = array<i64: 128, 128>}, {transform_indices = @transform_4, window_bounds = array<i64: 128, 128>}]} {
    %c0_i32 = arith.constant 0 : i32
    %0 = arith.cmpi eq, %arg1, %c0_i32 : i32
    %1 = arith.extui %0 : i1 to i32
    %c0_i32_0 = arith.constant 0 : i32
    %2 = arith.cmpi ne, %1, %c0_i32_0 : i32
    scf.if %2 {
      %cst_12 = arith.constant 0.000000e+00 : f32
      %24 = vector.broadcast %cst_12 : f32 to vector<128x128xf32>
      %c0_13 = arith.constant 0 : index
      %c0_14 = arith.constant 0 : index
      %25 = vector.load %arg6[%c0_13, %c0_14] : memref<128x128xf32, #tpu.memory_space<vmem>>, vector<128x128xf32>
      tpu.vector_store %arg6[%c0_13, %c0_14], %24 {strides = array<i32>} : memref<128x128xf32, #tpu.memory_space<vmem>>, vector<128x128xf32>,
    } else {
    }
    %c0 = arith.constant 0 : index
    %c0_1 = arith.constant 0 : index
    %3 = vector.load %arg2[%c0, %c0_1] : memref<128x1xf32, #tpu.memory_space<vmem>>, vector<128x1xf32>
    %c0_2 = arith.constant 0 : index
    %c0_3 = arith.constant 0 : index
    %4 = vector.load %arg3[%c0_2, %c0_3] : memref<1x128xf32, #tpu.memory_space<vmem>>, vector<1x128xf32>
    %5 = vector.broadcast %3 : vector<128x1xf32> to vector<128x128xf32>
    %6 = vector.broadcast %4 : vector<1x128xf32> to vector<128x128xf32>
    %7 = arith.addf %5, %6 : vector<128x128xf32>
    %8 = arith.negf %7 : vector<128x128xf32>
    %9 = math.exp %8 : vector<128x128xf32>
    %cst = arith.constant 1.000000e+00 : f32
    %10 = vector.broadcast %cst : f32 to vector<128x128xf32>
    %11 = arith.addf %10, %9 : vector<128x128xf32>
    %12 = arith.divf %10, %11 : vector<128x128xf32>
    %13 = arith.truncf %12 : vector<128x128xf32> to vector<128x128xbf16>
    %c0_4 = arith.constant 0 : index
    %c0_5 = arith.constant 0 : index
    %14 = vector.load %arg4[%c0_4, %c0_5] : memref<128x128xbf16, #tpu.memory_space<vmem>>, vector<128x128xbf16>
    %15 = arith.mulf %13, %14 : vector<128x128xbf16>
    %c128_i32 = arith.constant 128 : i32
    %16 = arith.muli %arg1, %c128_i32 : i32
    %17 = tpu.assume_multiple %16, 128 : i32
    %18 = arith.index_cast %17 : i32 to index
    %c0_6 = arith.constant 0 : index
    %19 = vector.load %arg5[%18, %c0_6] : memref<128x128xbf16, #tpu.memory_space<vmem>>, vector<128x128xbf16>
    %c0_7 = arith.constant 0 : index
    %c0_8 = arith.constant 0 : index
    %20 = vector.load %arg6[%c0_7, %c0_8] : memref<128x128xf32, #tpu.memory_space<vmem>>, vector<128x128xf32>
    %cst_9 = arith.constant dense<0.000000e+00> : vector<128x128xf32>
    %21 = tpu.matmul %15, %19, %cst_9 {dimension_numbers = #tpu.dot_dimension_numbers<[1], [0], [0], [1], [0, 0, 1, 1], [], []>} : vector<128x128xbf16>, vector<128x128xbf16>, vector<128x128xf32> -> vector<128x128xf32>
    %22 = arith.addf %20, %21 : vector<128x128xf32>
    %c0_10 = arith.constant 0 : index
    %c0_11 = arith.constant 0 : index
    %23 = vector.load %arg6[%c0_10, %c0_11] : memref<128x128xf32, #tpu.memory_space<vmem>>, vector<128x128xf32>
    tpu.vector_store %arg6[%c0_10, %c0_11], %22 {strides = array<i32>} : memref<128x128xf32, #tpu.memory_space<vmem>>, vector<128x128xf32>,
    return
  }
  func.func @transform_0(%arg0: i32, %arg1: i32) -> (i32, i32) {
    %c0_i32 = arith.constant 0 : i32
    %c0_i32_0 = arith.constant 0 : i32
    return %arg0, %c0_i32 : i32, i32
  }
  func.func @transform_1(%arg0: i32, %arg1: i32) -> (i32, i32) {
    %c0_i32 = arith.constant 0 : i32
    %c0_i32_0 = arith.constant 0 : i32
    return %c0_i32, %arg1 : i32, i32
  }
  func.func @transform_2(%arg0: i32, %arg1: i32) -> (i32, i32) {
    %c0_i32 = arith.constant 0 : i32
    return %arg0, %arg1 : i32, i32
  }
  func.func @transform_3(%arg0: i32, %arg1: i32) -> (i32, i32) {
    %c0_i32 = arith.constant 0 : i32
    %c0_i32_0 = arith.constant 0 : i32
    %c0_i32_1 = arith.constant 0 : i32
    return %c0_i32, %c0_i32_0 : i32, i32
  }
  func.func @transform_4(%arg0: i32, %arg1: i32) -> (i32, i32) {
    %c0_i32 = arith.constant 0 : i32
    %c0_i32_0 = arith.constant 0 : i32
    return %arg0, %c0_i32 : i32, i32
  }
}

</mosaic_0001>

<bundles_post_ra>
// kernel: tpu_custom_call.1
= control target key start
LH: loop header
LB: loop body
LE: loop exit
PB: predicated region body
PF: predicated region fallthrough
CT: control target
= control target key end

     0   :  { %v772_v2 = vmov 0   ;;  %s921_s0 = inlined_call_operand.vmem [shape: f32[128,1], index: 0, kind: input, shape index: {}]   ;;  %s922_s1 = inlined_call_operand.vmem [shape: f32[1,128], index: 1, kind: input, shape index: {}]   ;;  %s923_s2 = inlined_call_operand.vmem [shape: bf16[128,128], index: 2, kind: input, shape index: {}]   ;;  %s924_s3 = inlined_call_operand.vmem [shape: bf16[128,128], index: 3, kind: input, shape index: {}]   ;;  %s925_s4 = inlined_call_operand.hbm [shape: f32[128,128], index: 4, kind: output, shape index: {}]  }
   0x1   :  { %v47_v0 = vld [vmem:[%s921_s0 + $0x40] sm:$0xff]  ;;  %669 = vset.pattern.permute.xlu1 %v772_v2  ;;  %668 = vset.pattern.permute.xlu0 %v772_v2  ;;  %v48_v3 = vld [vmem:[%s921_s0 + $0x48] sm:$0xff]  ;;  %v42_v5 = vld [vmem:[%s921_s0 + $0x18] sm:$0xff] }
   0x2   :  { %v39_v1 = vld [vmem:[%s921_s0] sm:$0xff]  ;;  %98 = vperm.xlu1 %669, %v47_v0   ;;  %v40_v4 = vld [vmem:[%s921_s0 + $0x8] sm:$0xff]  ;;  %v41_v6 = vld [vmem:[%s921_s0 + $0x10] sm:$0xff] }
   0x3   :  { %58 = vperm.xlu0 %668, %v39_v1   ;;  %v50_v7 = vld [vmem:[%s921_s0 + $0x58] sm:$0xff]  ;;  %v49_v8 = vld [vmem:[%s921_s0 + $0x50] sm:$0xff]  ;;  %v44_v10 = vld [vmem:[%s921_s0 + $0x28] sm:$0xff] }
   0x4   :  { %v670_v9 = vld [vmem:[%s924_s3 + $0x38] sm:$0xff]   ;;  %v43_v11 = vld [vmem:[%s921_s0 + $0x20] sm:$0xff] }
   0x5   :  { %615 = vmatprep.subr.bf16.mxu0 %v670_v9  ;;  %647 = vmatprep.subr.bf16.mxu1 %v670_v9 }
   0x6   :  { %103 = vperm.xlu1 %669, %v48_v3   ;;  %616 = vmatpush3.bf16.msra.mxu0 %v670_v9 }
   0x7   :  { %63 = vperm.xlu0 %668, %v40_v4   ;;  %655 = vmatpush3.bf16.msra.mxu1 %v670_v9 }
   0xa   :  { %73 = vperm.xlu1 %669, %v42_v5  }
   0xb   :  { %68 = vperm.xlu0 %668, %v41_v6  }
   0xe   :  { %113 = vperm.xlu1 %669, %v50_v7  }
   0xf   :  { %108 = vperm.xlu0 %668, %v49_v8  }
  0x10   :  { %9 = vsyncpa [#allocation3], 0  ;;  %v671_v12 = vld [vmem:[%s924_s3 + $0x30] sm:$0xff]   ;;  %v52_v13 = vld [vmem:[%s921_s0 + $0x68] sm:$0xff] }
  0x11   :  { %v51_v14 = vld [vmem:[%s921_s0 + $0x60] sm:$0xff]  ;;  %617 = vmatprep.subr.bf16.mxu0 %v671_v12  ;;  %648 = vmatprep.subr.bf16.mxu1 %v671_v12  ;;  %v672_v15 = vld [vmem:[%s924_s3 + $0x28] sm:$0xff]   ;;  %v46_v16 = vld [vmem:[%s921_s0 + $0x38] sm:$0xff] }
  0x12   :  { %83 = vperm.xlu1 %669, %v44_v10   ;;  %618 = vmatpush3.bf16.msra.mxu0 %v671_v12  ;;  %v45_v17 = vld [vmem:[%s921_s0 + $0x30] sm:$0xff]  ;;  %v673_v18 = vld [vmem:[%s924_s3 + $0x20] sm:$0xff]   ;;  %v54_v19 = vld [vmem:[%s921_s0 + $0x78] sm:$0xff] }
  0x13   :  { %78 = vperm.xlu0 %668, %v43_v11   ;;  %656 = vmatpush3.bf16.msra.mxu1 %v671_v12  ;;  %v53_v20 = vld [vmem:[%s921_s0 + $0x70] sm:$0xff]  ;;  %v674_v21 = vld [vmem:[%s924_s3 + $0x18] sm:$0xff]   ;;  %v676_v23 = vld [vmem:[%s924_s3 + $0x8] sm:$0xff]  }
  0x14   :  { %619 = vmatprep.subr.bf16.mxu0 %v672_v15  ;;  %649 = vmatprep.subr.bf16.mxu1 %v672_v15  ;;  %v675_v22 = vld [vmem:[%s924_s3 + $0x10] sm:$0xff]   ;;  %v677_v24 = vld [vmem:[%s924_s3] sm:$0xff]  }
  0x15   :  { %v876_v25 = vld [vmem:[%s922_s1] ss:$0 sm:$0xff] }
  0x16   :  { %123 = vperm.xlu1 %669, %v52_v13   ;;  %620 = vmatpush3.bf16.msra.mxu0 %v672_v15 }
  0x17   :  { %118 = vperm.xlu0 %668, %v51_v14   ;;  %657 = vmatpush3.bf16.msra.mxu1 %v672_v15 }
  0x18   :  { %621 = vmatprep.subr.bf16.mxu0 %v673_v18  ;;  %650 = vmatprep.subr.bf16.mxu1 %v673_v18 }
  0x1a   :  { %93 = vperm.xlu1 %669, %v46_v16   ;;  %622 = vmatpush3.bf16.msra.mxu0 %v673_v18 }
  0x1b   :  { %88 = vperm.xlu0 %668, %v45_v17   ;;  %658 = vmatpush3.bf16.msra.mxu1 %v673_v18 }
  0x1c   :  { %623 = vmatprep.subr.bf16.mxu0 %v674_v21  ;;  %651 = vmatprep.subr.bf16.mxu1 %v674_v21 }
  0x1e   :  { %133 = vperm.xlu1 %669, %v54_v19   ;;  %624 = vmatpush3.bf16.msra.mxu0 %v674_v21 }
  0x1f   :  { %128 = vperm.xlu0 %668, %v53_v20   ;;  %659 = vmatpush3.bf16.msra.mxu1 %v674_v21 }
  0x20   :  { %625 = vmatprep.subr.bf16.mxu0 %v675_v22  ;;  %652 = vmatprep.subr.bf16.mxu1 %v675_v22 }
  0x22   :  { %626 = vmatpush3.bf16.msra.mxu0 %v675_v22 }
  0x23   :  { %660 = vmatpush3.bf16.msra.mxu1 %v675_v22  ;;  %627 = vmatprep.subr.bf16.mxu0 %v676_v23 }
  0x24   :  { %653 = vmatprep.subr.bf16.mxu1 %v676_v23 }
  0x26   :  { %628 = vmatpush3.bf16.msra.mxu0 %v676_v23 }
  0x27   :  { %661 = vmatpush3.bf16.msra.mxu1 %v676_v23  ;;  %629 = vmatprep.subr.bf16.mxu0 %v677_v24 }
  0x28   :  { %654 = vmatprep.subr.bf16.mxu1 %v677_v24 }
  0x2a   :  { %630 = vmatpush3.bf16.msra.mxu0 %v677_v24 }
  0x2b   :  { %662 = vmatpush3.bf16.msra.mxu1 %v677_v24 }
  0x7d   :  { %v99_v26 = vpop.permute.xlu1 %98 }
  0x7e   :  { %v59_v27 = vpop.permute.xlu0 %58  ;;  %v150_v28 = vadd.f32 %v876_v25, %v99_v26 }
  0x7f   :  { %v142_v29 = vadd.f32 %v876_v25, %v59_v27 }
  0x80   :  { %v575_v30 = vmul.f32 -1.442695, %v150_v28 }
  0x81   :  { %v567_v31 = vmul.f32 -1.442695, %v142_v29  ;;  %v104_v32 = vpop.permute.xlu1 %103 }
  0x82   :  { %v64_v33 = vpop.permute.xlu0 %63  ;;  %686 = vpow2.f32 %v575_v30  ;;  %v151_v34 = vadd.f32 %v876_v25, %v104_v32 }
  0x83   :  { %v143_v35 = vadd.f32 %v876_v25, %v64_v33  ;;  %688 = vpow2.f32 %v567_v31 }
  0x84   :  { %v576_v36 = vmul.f32 -1.442695, %v151_v34  ;;  %v678_v34 = vld [vmem:[%s923_s2] sm:$0xff]  }
  0x85   :  { %v568_v37 = vmul.f32 -1.442695, %v143_v35  ;;  %v74_v38 = vpop.permute.xlu1 %73 }
  0x86   :  { %v69_v39 = vpop.permute.xlu0 %68  ;;  %690 = vpow2.f32 %v576_v36  ;;  %v145_v40 = vadd.f32 %v876_v25, %v74_v38 }
  0x87   :  { %v144_v41 = vadd.f32 %v876_v25, %v69_v39  ;;  %692 = vpow2.f32 %v568_v37 }
  0x88   :  { %v570_v42 = vmul.f32 -1.442695, %v145_v40 }
  0x89   :  { %v569_v43 = vmul.f32 -1.442695, %v144_v41  ;;  %v114_v44 = vpop.permute.xlu1 %113 }
  0x8a   :  { %v109_v45 = vpop.permute.xlu0 %108  ;;  %694 = vpow2.f32 %v570_v42  ;;  %v153_v46 = vadd.f32 %v876_v25, %v114_v44 }
  0x8b   :  { %v152_v47 = vadd.f32 %v876_v25, %v109_v45  ;;  %696 = vpow2.f32 %v569_v43  ;;  %v680_v45 = vld [vmem:[%s923_s2 + $0x8] sm:$0xff]  }
  0x8c   :  { %v578_v48 = vmul.f32 -1.442695, %v153_v46 }
  0x8d   :  { %v577_v49 = vmul.f32 -1.442695, %v152_v47  ;;  %v84_v50 = vpop.permute.xlu1 %83 }
  0x8e   :  { %v79_v51 = vpop.permute.xlu0 %78  ;;  %698 = vpow2.f32 %v578_v48  ;;  %v147_v52 = vadd.f32 %v876_v25, %v84_v50 }
  0x8f   :  { %v146_v53 = vadd.f32 %v876_v25, %v79_v51  ;;  %v687_v54 = vpop.eup %686  ;;  %700 = vpow2.f32 %v577_v49 }
  0x90   :  { %v689_v55 = vpop.eup %688  ;;  %v214_v56 = vadd.f32 1.0, %v687_v54  ;;  %v572_v57 = vmul.f32 -1.442695, %v147_v52  ;;  %v681_v54 = vld [vmem:[%s923_s2 + $0x28] sm:$0xff]  }
  0x91   :  { %v206_v58 = vadd.f32 1.0, %v689_v55  ;;  %v571_v59 = vmul.f32 -1.442695, %v146_v53  ;;  %v124_v60 = vpop.permute.xlu1 %123 }
  0x92   :  { %v119_v61 = vpop.permute.xlu0 %118  ;;  %702 = vrcp.f32 %v214_v56  ;;  %v155_v62 = vadd.f32 %v876_v25, %v124_v60 }
  0x93   :  { %v154_v63 = vadd.f32 %v876_v25, %v119_v61  ;;  %v691_v0 = vpop.eup %690  ;;  %704 = vrcp.f32 %v206_v58 }
  0x94   :  { %v693_v1 = vpop.eup %692  ;;  %v215_v2 = vadd.f32 1.0, %v691_v0  ;;  %706 = vpow2.f32 %v572_v57  ;;  %v580_v3 = vmul.f32 -1.442695, %v155_v62 }
  0x95   :  { %v207_v4 = vadd.f32 1.0, %v693_v1  ;;  %708 = vpow2.f32 %v571_v59  ;;  %v579_v5 = vmul.f32 -1.442695, %v154_v63  ;;  %v94_v6 = vpop.permute.xlu1 %93  ;;  %v682_v63 = vld [vmem:[%s923_s2 + $0x10] sm:$0xff]  }
  0x96   :  { %v89_v7 = vpop.permute.xlu0 %88  ;;  %710 = vrcp.f32 %v215_v2  ;;  %v149_v8 = vadd.f32 %v876_v25, %v94_v6 }
  0x97   :  { %v148_v9 = vadd.f32 %v876_v25, %v89_v7  ;;  %v695_v10 = vpop.eup %694  ;;  %712 = vrcp.f32 %v207_v4  ;;  %v683_v4 = vld [vmem:[%s923_s2 + $0x30] sm:$0xff]  }
  0x98   :  { %v697_v11 = vpop.eup %696  ;;  %v209_v12 = vadd.f32 1.0, %v695_v10  ;;  %714 = vpow2.f32 %v580_v3  ;;  %v574_v13 = vmul.f32 -1.442695, %v149_v8 }
  0x99   :  { %v208_v14 = vadd.f32 1.0, %v697_v11  ;;  %716 = vpow2.f32 %v579_v5  ;;  %v573_v15 = vmul.f32 -1.442695, %v148_v9  ;;  %v134_v16 = vpop.permute.xlu1 %133  ;;  %v684_v9 = vld [vmem:[%s923_s2 + $0x18] sm:$0xff]  }
  0x9a   :  { %v129_v17 = vpop.permute.xlu0 %128  ;;  %718 = vrcp.f32 %v209_v12  ;;  %v157_v18 = vadd.f32 %v876_v25, %v134_v16 }
  0x9b   :  { %v156_v19 = vadd.f32 %v876_v25, %v129_v17  ;;  %v699_v20 = vpop.eup %698  ;;  %720 = vrcp.f32 %v208_v14  ;;  %v679_v25 = vld [vmem:[%s923_s2 + $0x20] sm:$0xff]   ;;  %v685_v14 = vld [vmem:[%s923_s2 + $0x38] sm:$0xff]   ;;  %s773_s2 = smov [#allocation2]  }
  0x9c   :  { %v701_v21 = vpop.eup %700  ;;  %v217_v22 = vadd.f32 1.0, %v699_v20  ;;  %722 = vpow2.f32 %v574_v13  ;;  %v582_v23 = vmul.f32 -1.442695, %v157_v18  ;;  %s553_s26 = sshll.u32 %s773_s2, 4  ;;  %s554_s26 = int_to_ptr.vmem [resolvable:$true] %s553_s26 }
  0x9d   :  { %v216_v24 = vadd.f32 1.0, %v701_v21  ;;  %724 = vpow2.f32 %v573_v15  ;;  %v581_v26 = vmul.f32 -1.442695, %v156_v19  ;;  %s750_s27 = scalar_lea.vmem %s554_s26, 2048  ;;  %p755_p1 = scmp.lt.s32.totalorder %s554_s26, %s554_s26 }
  0x9e   :  { %726 = vrcp.f32 %v217_v22  ;;  %p751_p0 = scmp.ne.s32.totalorder %s554_s26, %s750_s27  ;;  %p756_p2 = scmp.lt.s32.totalorder %s750_s27, %s750_s27 }
  0x9f   :  { %v703_v27 = vpop.eup %702  ;;  %728 = vrcp.f32 %v216_v24 }
  0xa0   :  { %v705_v28 = vpop.eup %704  ;;  %730 = vpow2.f32 %v582_v23  ;;  %p757_p3 = por %p756_p2, %p755_p1 }
  0xa1   :  { %v707_v29 = vpop.eup %706  ;;  %732 = vpow2.f32 %v581_v26 }
  0xa2   :  { %v709_v30 = vpop.eup %708  ;;  %v211_v31 = vadd.f32 1.0, %v707_v29  ;;  %p758_p4 = pnand %p757_p3, %p751_p0 }
  0xa3   :  { %v711_v32 = vpop.eup %710  ;;  %v210_v33 = vadd.f32 1.0, %v709_v30 }
  0xa4   :  { %v713_v35 = vpop.eup %712  ;;  %734 = vrcp.f32 %v211_v31  ;;  %v258_v36 = vpack.c.bf16 %v711_v32, %v703_v27 }
  0xa5   :  { %v715_v37 = vpop.eup %714  ;;  %736 = vrcp.f32 %v210_v33  ;;  %v254_v38 = vpack.c.bf16 %v713_v35, %v705_v28 }
  0xa6   :  { %v717_v39 = vpop.eup %716  ;;  %v219_v40 = vadd.f32 1.0, %v715_v37  ;;  %v330_v41 = vmul.bf16 %v679_v25, %v258_v36 }
  0xa7   :  { %v719_v42 = vpop.eup %718  ;;  %v218_v43 = vadd.f32 1.0, %v717_v39  ;;  %v326_v44 = vmul.bf16 %v678_v34, %v254_v38 }
  0xa8   :  { %v721_v46 = vpop.eup %720  ;;  %738 = vrcp.f32 %v219_v40  ;;  %639 = vmatprep.mubr.bf16.mxu1 %v330_v41 }
  0xa9   :  { %v723_v47 = vpop.eup %722  ;;  %740 = vrcp.f32 %v218_v43  ;;  %631 = vmatprep.mubr.bf16.mxu0 %v326_v44  ;;  %v255_v48 = vpack.c.bf16 %v719_v42, %v721_v46 }
  0xaa   :  { %v725_v49 = vpop.eup %724  ;;  %v213_v50 = vadd.f32 1.0, %v723_v47 }
  0xab   :  { %v727_v51 = vpop.eup %726  ;;  %v212_v52 = vadd.f32 1.0, %v725_v49  ;;  %v327_v53 = vmul.bf16 %v680_v45, %v255_v48 }
  0xac   :  { %v729_v55 = vpop.eup %728  ;;  %742 = vrcp.f32 %v213_v50 }
  0xad   :  { %v731_v56 = vpop.eup %730  ;;  %744 = vrcp.f32 %v212_v52  ;;  %632 = vmatmul.mubr.bf16.vlgmr.msra.gmra.mxu0 %v327_v53  ;;  %v259_v57 = vpack.c.bf16 %v727_v51, %v729_v55 }
  0xae   :  { %v733_v58 = vpop.eup %732  ;;  %v221_v59 = vadd.f32 1.0, %v731_v56 }
  0xaf   :  { %v220_v60 = vadd.f32 1.0, %v733_v58  ;;  %v331_v61 = vmul.bf16 %v681_v54, %v259_v57 }
  0xb0   :  { %746 = vrcp.f32 %v221_v59 }
  0xb1   :  { %v735_v62 = vpop.eup %734  ;;  %748 = vrcp.f32 %v220_v60  ;;  %640 = vmatmul.mubr.bf16.vlgmr.msra.gmra.mxu1 %v331_v61 }
  0xb2   :  { %v737_v0 = vpop.eup %736 }
  0xb3   :  { %v256_v1 = vpack.c.bf16 %v735_v62, %v737_v0 }
  0xb5   :  { %v739_v2 = vpop.eup %738  ;;  %v328_v3 = vmul.bf16 %v682_v63, %v256_v1 }
  0xb6   :  { %v741_v5 = vpop.eup %740 }
  0xb7   :  { %635 = vmatprep.mubr.bf16.mxu0 %v328_v3  ;;  %v260_v6 = vpack.c.bf16 %v739_v2, %v741_v5 }
  0xb9   :  { %v743_v7 = vpop.eup %742  ;;  %v332_v8 = vmul.bf16 %v683_v4, %v260_v6 }
  0xba   :  { %v745_v10 = vpop.eup %744 }
  0xbb   :  { %643 = vmatprep.mubr.bf16.mxu1 %v332_v8  ;;  %v257_v11 = vpack.c.bf16 %v743_v7, %v745_v10 }
  0xbd   :  { %v747_v12 = vpop.eup %746  ;;  %v329_v13 = vmul.bf16 %v684_v9, %v257_v11 }
  0xbe   :  { %v749_v15 = vpop.eup %748 }
  0xbf   :  { %636 = vmatmul.mubr.bf16.gmra.mxu0 %v329_v13  ;;  %v261_v16 = vpack.c.bf16 %v747_v12, %v749_v15 }
  0xc1   :  { %v333_v17 = vmul.bf16 %v685_v14, %v261_v16 }
  0xc3   :  { %644 = vmatmul.mubr.bf16.gmra.mxu1 %v333_v17 }
 0x16d   :  { %v633_v18 = vpop.f32.mrf.mxu0 }
 0x16e   :  { %534 = vst [vmem:[#allocation2 + $0x10] sm:$0xff] %v633_v18 }
 0x16f   :  { %v453_v19 = vpop.f32.mrf.mxu0 }
 0x170   :  { %532 = vst [vmem:[#allocation2] sm:$0xff] %v453_v19 }
 0x171   :  { %v634_v20 = vpop.f32.mrf.mxu0  ;;  %v641_v21 = vpop.f32.mrf.mxu1 }
 0x172   :  { %535 = vst [vmem:[#allocation2 + $0x18] sm:$0xff] %v634_v20  ;;  %542 = vst [vmem:[#allocation2 + $0x50] sm:$0xff] %v641_v21 }
 0x173   :  { %v456_v22 = vpop.f32.mrf.mxu0  ;;  %v485_v23 = vpop.f32.mrf.mxu1 }
 0x174   :  { %533 = vst [vmem:[#allocation2 + $0x8] sm:$0xff] %v456_v22  ;;  %540 = vst [vmem:[#allocation2 + $0x40] sm:$0xff] %v485_v23 }
 0x175   :  { %v642_v24 = vpop.f32.mrf.mxu1 }
 0x176   :  { %543 = vst [vmem:[#allocation2 + $0x58] sm:$0xff] %v642_v24 }
 0x177   :  { %v488_v26 = vpop.f32.mrf.mxu1 }
 0x178   :  { %541 = vst [vmem:[#allocation2 + $0x48] sm:$0xff] %v488_v26 }
 0x17f   :  { %v637_v27 = vpop.f32.mrf.mxu0 }
 0x180   :  { %538 = vst [vmem:[#allocation2 + $0x30] sm:$0xff] %v637_v27 }
 0x181   :  { %v469_v28 = vpop.f32.mrf.mxu0 }
 0x182   :  { %536 = vst [vmem:[#allocation2 + $0x20] sm:$0xff] %v469_v28 }
 0x183   :  { %v638_v29 = vpop.f32.mrf.mxu0  ;;  %v645_v30 = vpop.f32.mrf.mxu1 }
 0x184   :  { %539 = vst [vmem:[#allocation2 + $0x38] sm:$0xff] %v638_v29  ;;  %546 = vst [vmem:[#allocation2 + $0x70] sm:$0xff] %v645_v30 }
 0x185   :  { %v472_v31 = vpop.f32.mrf.mxu0  ;;  %v501_v25 = vpop.f32.mrf.mxu1 }
 0x186   :  { %537 = vst [vmem:[#allocation2 + $0x28] sm:$0xff] %v472_v31  ;;  %544 = vst [vmem:[#allocation2 + $0x60] sm:$0xff] %v501_v25 }
 0x187   :  { %v646_v32 = vpop.f32.mrf.mxu1 }
 0x188   :  { %547 = vst [vmem:[#allocation2 + $0x78] sm:$0xff] %v646_v32 }
 0x189   :  { %v504_v33 = vpop.f32.mrf.mxu1 }
 0x18a   :  { %545 = vst [vmem:[#allocation2 + $0x68] sm:$0xff] %v504_v33 }
 0x18b   :  { %761 = shalt.err (!%p758_p4)
}
 0x18c   :  { %s774_s28 = smov 128   ;;  %s775_s29 = smov 8  }
 0x18d   :  { %559 = dma.vmem_to_hbm [thread:$0]  %s554_s26, 2048, %s925_s4, [#allocation3], %s774_s28, %s774_s28, %s775_s29  }
 0x18e   :  { %770 = dma.done.wait [#allocation3], 2048  }
 0x18f   :  { %771 = vsyncadd [#allocation3], 4294965248 }
 0x190   :  { %563 = vsyncpa [#allocation3], 1 }

</bundles_post_ra>
